<compile_context>
chip_gen: v6e
topology: v6e:2x2x1
jax: 0.10.0
libtpu: 0.0.40
codegen_flags: <defaults>
</compile_context>

<pallas_src>
import math
import functools

import jax
import jax.numpy as jnp
from jax.experimental import pallas as pl
from jax.experimental.pallas import tpu as pltpu

# ----------------------------- configuration -------------------------------
EMBED_DIM = 32
NUM_HEADS = 4
NUM_HEADS_KV = 2            # GQA: num_heads % num_heads_kv == 0
HEAD_DIM = EMBED_DIM // NUM_HEADS
MLP_DIM = 0                 # TODO(synk): mlp_dim>0 (gated SiLU MLP branch) not instantiated here
D_CONV = 0                  # TODO(synk): d_conv>0 (depthwise causal conv1d branch) not instantiated here
CAUSAL = False
SOFTMAX_SCALE = None        # None -> 1/sqrt(head_dim), like F.scaled_dot_product_attention

QKV_DIM = HEAD_DIM * (NUM_HEADS + 2 * NUM_HEADS_KV)   # q + k + v, flat
OUT_DIM = HEAD_DIM * NUM_HEADS

BATCH = 2
SEQ = 8


# ------------------------------- kernel ------------------------------------
def mha_kernel(x_ref, win_ref, bin_ref, wout_ref, bout_ref, o_ref,
               *, batch, seq, num_heads, num_heads_kv, head_dim, causal):
    """Whole problem in one invocation (no grid).

    x_ref   : (B*S, E)        input rows (all batches flattened)
    win_ref : (E, QKV_DIM)    in_proj weight, transposed vs torch; q-cols pre-scaled
    bin_ref : (1, QKV_DIM)    in_proj bias; q entries pre-scaled
    wout_ref: (OUT_DIM, E)    out_proj weight, transposed vs torch
    bout_ref: (1, E)          out_proj bias
    o_ref   : (B*S, E)        output rows
    """
    rep = num_heads // num_heads_kv
    q_dim = num_heads * head_dim
    kv_dim = num_heads_kv * head_dim

    x = x_ref[...]                                                     # (B*S, E)

    # ---- in_proj: one matmul for every row of every batch ----
    qkv = jnp.dot(x, win_ref[...], preferred_element_type=jnp.float32)
    qkv = qkv + bin_ref[...]                                           # (B*S, QKV_DIM)

    if causal:
        # Row-stacked rep heads: query position is (row % seq).
        row = jax.lax.broadcasted_iota(jnp.int32, (rep * seq, seq), 0) % seq
        col = jax.lax.broadcasted_iota(jnp.int32, (rep * seq, seq), 1)
        causal_bias = jnp.where(col > row, -1e30, 0.0).astype(jnp.float32)

    batch_ctx = []
    for b in range(batch):
        rows = slice(b * seq, (b + 1) * seq)
        head_ctx = [None] * num_heads
        for g in range(num_heads_kv):
            # Shared K/V for this GQA group (hoisted out of the rep loop).
            k_h = qkv[rows, q_dim + g * head_dim: q_dim + (g + 1) * head_dim]            # (S, dh)
            v_h = qkv[rows, q_dim + kv_dim + g * head_dim: q_dim + kv_dim + (g + 1) * head_dim]
            kT = k_h.T                                                                   # one transpose per group

            # Row-stack the `rep` query heads that attend to this KV head so the
            # score / softmax / PV work is done with one matmul pair per group.
            q_stack = jnp.concatenate(
                [qkv[rows, (g * rep + r) * head_dim: (g * rep + r + 1) * head_dim]
                 for r in range(rep)],
                axis=0)                                                                  # (rep*S, dh)

            # Scale already folded into the q columns of W_in / b_in.
            s = jnp.dot(q_stack, kT, preferred_element_type=jnp.float32)                 # (rep*S, S)
            if causal:
                s = s + causal_bias
            s = s - jnp.max(s, axis=-1, keepdims=True)
            p = jnp.exp(s)
            denom = jnp.sum(p, axis=-1, keepdims=True)
            p = p * pl.reciprocal(denom, approx=True)                                    # EUP vrcp
            ctx = jnp.dot(p, v_h, preferred_element_type=jnp.float32)                    # (rep*S, dh)

            for r in range(rep):
                head_ctx[g * rep + r] = ctx[r * seq:(r + 1) * seq, :]                    # (S, dh)

        batch_ctx.append(jnp.concatenate(head_ctx, axis=-1))                             # (S, H*dh)

    context = jnp.concatenate(batch_ctx, axis=0)                                         # (B*S, H*dh)

    # ---- out_proj: one matmul for all rows ----
    out = jnp.dot(context, wout_ref[...], preferred_element_type=jnp.float32)
    out = out + bout_ref[...]                                                            # (B*S, E)

    o_ref[...] = out.astype(o_ref.dtype)


# ------------------------------- wrapper ------------------------------------
def mha_forward(x, w_in, b_in, w_out, b_out):
    """x: (B, S, E) float32 -> (B, S, E) float32."""
    B, S, E = x.shape
    assert MLP_DIM == 0 and D_CONV == 0, "kernel instantiated for mlp_dim=0, d_conv=0"
    assert w_in.shape == (E, QKV_DIM), w_in.shape
    assert b_in.shape == (1, QKV_DIM), b_in.shape
    assert w_out.shape == (OUT_DIM, E), w_out.shape
    assert b_out.shape == (1, E), b_out.shape

    scale = SOFTMAX_SCALE if SOFTMAX_SCALE is not None else 1.0 / math.sqrt(HEAD_DIM)
    q_dim = NUM_HEADS * HEAD_DIM

    # Fold the softmax scale into the q columns of the in_proj (done once, host side).
    w_in_s = w_in.at[:, :q_dim].multiply(scale)
    b_in_s = b_in.at[:, :q_dim].multiply(scale)

    x2 = x.reshape(B * S, E)

    flops = (2 * (B * S) * E * QKV_DIM                      # in_proj
             + 2 * B * NUM_HEADS * (2 * S * S * HEAD_DIM)   # scores + PV
             + 2 * (B * S) * OUT_DIM * E)                   # out_proj
    transcendentals = B * NUM_HEADS * S * S                 # exp in softmax
    bytes_accessed = 4 * (x2.size + w_in.size + b_in.size + w_out.size + b_out.size
                          + B * S * E)

    kernel = functools.partial(
        mha_kernel,
        batch=B, seq=S,
        num_heads=NUM_HEADS, num_heads_kv=NUM_HEADS_KV, head_dim=HEAD_DIM,
        causal=CAUSAL,
    )

    out2 = pl.pallas_call(
        kernel,
        out_shape=jax.ShapeDtypeStruct((B * S, E), x.dtype),
        in_specs=[
            pl.BlockSpec(memory_space=pltpu.MemorySpace.VMEM),   # x (flattened)
            pl.BlockSpec(memory_space=pltpu.MemorySpace.VMEM),   # w_in (scaled)
            pl.BlockSpec(memory_space=pltpu.MemorySpace.VMEM),   # b_in (scaled)
            pl.BlockSpec(memory_space=pltpu.MemorySpace.VMEM),   # w_out
            pl.BlockSpec(memory_space=pltpu.MemorySpace.VMEM),   # b_out
        ],
        out_specs=pl.BlockSpec(memory_space=pltpu.MemorySpace.VMEM),
        cost_estimate=pl.CostEstimate(
            flops=flops,
            transcendentals=transcendentals,
            bytes_accessed=bytes_accessed,
        ),
    )(x2, w_in_s, b_in_s, w_out, b_out)

    return out2.reshape(B, S, E)


# --------------------------- pure-JAX reference ------------------------------
def mha_reference(x, w_in, b_in, w_out, b_out):
    scale = SOFTMAX_SCALE if SOFTMAX_SCALE is not None else 1.0 / math.sqrt(HEAD_DIM)
    B, S, E = x.shape
    qkv = jnp.einsum("bse,ed->bsd", x, w_in) + b_in[0]
    q_dim = NUM_HEADS * HEAD_DIM
    kv_dim = NUM_HEADS_KV * HEAD_DIM
    q = qkv[..., :q_dim].reshape(B, S, NUM_HEADS, HEAD_DIM)
    k = qkv[..., q_dim:q_dim + kv_dim].reshape(B, S, NUM_HEADS_KV, HEAD_DIM)
    v = qkv[..., q_dim + kv_dim:].reshape(B, S, NUM_HEADS_KV, HEAD_DIM)
    rep = NUM_HEADS // NUM_HEADS_KV
    k = jnp.repeat(k, rep, axis=2)
    v = jnp.repeat(v, rep, axis=2)
    s = jnp.einsum("bqhd,bkhd->bhqk", q, k) * scale
    if CAUSAL:
        mask = jnp.tril(jnp.ones((S, S), dtype=bool))
        s = jnp.where(mask[None, None], s, -jnp.inf)
    p = jax.nn.softmax(s, axis=-1)
    ctx = jnp.einsum("bhqk,bkhd->bqhd", p, v).reshape(B, S, OUT_DIM)
    return jnp.einsum("bsd,de->bse", ctx, w_out) + b_out[0]


# --------------------------------- main --------------------------------------
if __name__ == "__main__":
    key = jax.random.PRNGKey(0)
    kx, k1, k2, k3, k4 = jax.random.split(key, 5)

    x = jax.random.normal(kx, (BATCH, SEQ, EMBED_DIM), dtype=jnp.float32)

    # PyTorch nn.Linear default init: U(-1/sqrt(fan_in), 1/sqrt(fan_in)).
    bound_in = 1.0 / math.sqrt(EMBED_DIM)
    w_in = jax.random.uniform(k1, (EMBED_DIM, QKV_DIM + MLP_DIM),
                              minval=-bound_in, maxval=bound_in, dtype=jnp.float32)
    b_in = jax.random.uniform(k2, (1, QKV_DIM + MLP_DIM),
                              minval=-bound_in, maxval=bound_in, dtype=jnp.float32)

    bound_out = 1.0 / math.sqrt(OUT_DIM + MLP_DIM // 2)
    w_out = jax.random.uniform(k3, (OUT_DIM + MLP_DIM // 2, EMBED_DIM),
                               minval=-bound_out, maxval=bound_out, dtype=jnp.float32)
    b_out = jax.random.uniform(k4, (1, EMBED_DIM),
                               minval=-bound_out, maxval=bound_out, dtype=jnp.float32)

    out = mha_forward(x, w_in, b_in, w_out, b_out)
    out = jax.block_until_ready(out)

    ref = mha_reference(x, w_in, b_in, w_out, b_out)
    assert out.shape == (BATCH, SEQ, EMBED_DIM), out.shape
    # Slightly loosened vs 1e-4 because the softmax denominator uses the EUP
    # approx reciprocal; still far tighter than any real bug would produce.
    assert jnp.allclose(out, ref, atol=2e-3, rtol=2e-3), float(jnp.max(jnp.abs(out - ref)))

    print("KERNEL_OK")
</pallas_src>

<mosaic_0001>
module attributes {stable_mosaic.version = 11 : i64} {
  func.func @mha_kernel(%arg0: memref<16x32xf32, #tpu.memory_space<vmem>>, %arg1: memref<32x64xf32, #tpu.memory_space<vmem>>, %arg2: memref<1x64xf32, #tpu.memory_space<vmem>>, %arg3: memref<32x32xf32, #tpu.memory_space<vmem>>, %arg4: memref<1x32xf32, #tpu.memory_space<vmem>>, %arg5: memref<16x32xf32, #tpu.memory_space<vmem>>) attributes {dimension_semantics = [], scalar_prefetch = 0 : i64, scratch_operands = 0 : i64, tpu.core_type = #tpu.core_type<tc>} {
    %c0 = arith.constant 0 : index
    %c0_0 = arith.constant 0 : index
    %0 = vector.load %arg0[%c0, %c0_0] : memref<16x32xf32, #tpu.memory_space<vmem>>, vector<16x32xf32>
    %c0_1 = arith.constant 0 : index
    %c0_2 = arith.constant 0 : index
    %1 = vector.load %arg1[%c0_1, %c0_2] : memref<32x64xf32, #tpu.memory_space<vmem>>, vector<32x64xf32>
    %cst = arith.constant dense<0.000000e+00> : vector<16x64xf32>
    %2 = tpu.matmul %0, %1, %cst {dimension_numbers = #tpu.dot_dimension_numbers<[1], [0], [0], [1], [0, 0, 1, 1], [], []>} : vector<16x32xf32>, vector<32x64xf32>, vector<16x64xf32> -> vector<16x64xf32>
    %c0_3 = arith.constant 0 : index
    %c0_4 = arith.constant 0 : index
    %3 = vector.load %arg2[%c0_3, %c0_4] : memref<1x64xf32, #tpu.memory_space<vmem>>, vector<1x64xf32>
    %4 = vector.broadcast %3 : vector<1x64xf32> to vector<16x64xf32>
    %5 = arith.addf %2, %4 : vector<16x64xf32>
    %6 = vector.extract_strided_slice %5 {offsets = [0, 32], sizes = [8, 8], strides = [1, 1]} : vector<16x64xf32> to vector<8x8xf32>
    %7 = vector.extract_strided_slice %5 {offsets = [0, 48], sizes = [8, 8], strides = [1, 1]} : vector<16x64xf32> to vector<8x8xf32>
    %8 = tpu.transpose %6, [1, 0] : vector<8x8xf32> -> vector<8x8xf32>
    %9 = vector.extract_strided_slice %5 {offsets = [0, 0], sizes = [8, 8], strides = [1, 1]} : vector<16x64xf32> to vector<8x8xf32>
    %10 = vector.extract_strided_slice %5 {offsets = [0, 8], sizes = [8, 8], strides = [1, 1]} : vector<16x64xf32> to vector<8x8xf32>
    %11 = tpu.concatenate %9, %10 in 0 : vector<8x8xf32>, vector<8x8xf32> -> vector<16x8xf32>
    %cst_5 = arith.constant dense<0.000000e+00> : vector<16x8xf32>
    %12 = tpu.matmul %11, %8, %cst_5 {dimension_numbers = #tpu.dot_dimension_numbers<[1], [0], [0], [1], [0, 0, 1, 1], [], []>} : vector<16x8xf32>, vector<8x8xf32>, vector<16x8xf32> -> vector<16x8xf32>
    %cst_6 = arith.constant dense<0xFF800000> : vector<16xf32>
    %13 = vector.multi_reduction <maximumf>, %12, %cst_6 [1] : vector<16x8xf32> to vector<16xf32>
    %14 = vector.shape_cast %13 : vector<16xf32> to vector<16x1xf32>
    %15 = vector.broadcast %14 : vector<16x1xf32> to vector<16x8xf32>
    %16 = arith.subf %12, %15 : vector<16x8xf32>
    %17 = math.exp %16 : vector<16x8xf32>
    %cst_7 = arith.constant dense<0.000000e+00> : vector<16xf32>
    %18 = vector.multi_reduction <add>, %17, %cst_7 [1] : vector<16x8xf32> to vector<16xf32>
    %19 = vector.shape_cast %18 : vector<16xf32> to vector<16x1xf32>
    %20 = tpu.reciprocal %19 {approx = true} : vector<16x1xf32> -> vector<16x1xf32>
    %21 = vector.broadcast %20 : vector<16x1xf32> to vector<16x8xf32>
    %22 = arith.mulf %17, %21 : vector<16x8xf32>
    %cst_8 = arith.constant dense<0.000000e+00> : vector<16x8xf32>
    %23 = tpu.matmul %22, %7, %cst_8 {dimension_numbers = #tpu.dot_dimension_numbers<[1], [0], [0], [1], [0, 0, 1, 1], [], []>} : vector<16x8xf32>, vector<8x8xf32>, vector<16x8xf32> -> vector<16x8xf32>
    %24 = vector.extract_strided_slice %23 {offsets = [0, 0], sizes = [8, 8], strides = [1, 1]} : vector<16x8xf32> to vector<8x8xf32>
    %25 = vector.extract_strided_slice %23 {offsets = [8, 0], sizes = [8, 8], strides = [1, 1]} : vector<16x8xf32> to vector<8x8xf32>
    %26 = vector.extract_strided_slice %5 {offsets = [0, 40], sizes = [8, 8], strides = [1, 1]} : vector<16x64xf32> to vector<8x8xf32>
    %27 = vector.extract_strided_slice %5 {offsets = [0, 56], sizes = [8, 8], strides = [1, 1]} : vector<16x64xf32> to vector<8x8xf32>
    %28 = tpu.transpose %26, [1, 0] : vector<8x8xf32> -> vector<8x8xf32>
    %29 = vector.extract_strided_slice %5 {offsets = [0, 16], sizes = [8, 8], strides = [1, 1]} : vector<16x64xf32> to vector<8x8xf32>
    %30 = vector.extract_strided_slice %5 {offsets = [0, 24], sizes = [8, 8], strides = [1, 1]} : vector<16x64xf32> to vector<8x8xf32>
    %31 = tpu.concatenate %29, %30 in 0 : vector<8x8xf32>, vector<8x8xf32> -> vector<16x8xf32>
    %cst_9 = arith.constant dense<0.000000e+00> : vector<16x8xf32>
    %32 = tpu.matmul %31, %28, %cst_9 {dimension_numbers = #tpu.dot_dimension_numbers<[1], [0], [0], [1], [0, 0, 1, 1], [], []>} : vector<16x8xf32>, vector<8x8xf32>, vector<16x8xf32> -> vector<16x8xf32>
    %cst_10 = arith.constant dense<0xFF800000> : vector<16xf32>
    %33 = vector.multi_reduction <maximumf>, %32, %cst_10 [1] : vector<16x8xf32> to vector<16xf32>
    %34 = vector.shape_cast %33 : vector<16xf32> to vector<16x1xf32>
    %35 = vector.broadcast %34 : vector<16x1xf32> to vector<16x8xf32>
    %36 = arith.subf %32, %35 : vector<16x8xf32>
    %37 = math.exp %36 : vector<16x8xf32>
    %cst_11 = arith.constant dense<0.000000e+00> : vector<16xf32>
    %38 = vector.multi_reduction <add>, %37, %cst_11 [1] : vector<16x8xf32> to vector<16xf32>
    %39 = vector.shape_cast %38 : vector<16xf32> to vector<16x1xf32>
    %40 = tpu.reciprocal %39 {approx = true} : vector<16x1xf32> -> vector<16x1xf32>
    %41 = vector.broadcast %40 : vector<16x1xf32> to vector<16x8xf32>
    %42 = arith.mulf %37, %41 : vector<16x8xf32>
    %cst_12 = arith.constant dense<0.000000e+00> : vector<16x8xf32>
    %43 = tpu.matmul %42, %27, %cst_12 {dimension_numbers = #tpu.dot_dimension_numbers<[1], [0], [0], [1], [0, 0, 1, 1], [], []>} : vector<16x8xf32>, vector<8x8xf32>, vector<16x8xf32> -> vector<16x8xf32>
    %44 = vector.extract_strided_slice %43 {offsets = [0, 0], sizes = [8, 8], strides = [1, 1]} : vector<16x8xf32> to vector<8x8xf32>
    %45 = vector.extract_strided_slice %43 {offsets = [8, 0], sizes = [8, 8], strides = [1, 1]} : vector<16x8xf32> to vector<8x8xf32>
    %46 = tpu.concatenate %24, %25, %44, %45 in 1 : vector<8x8xf32>, vector<8x8xf32>, vector<8x8xf32>, vector<8x8xf32> -> vector<8x32xf32>
    %47 = vector.extract_strided_slice %5 {offsets = [8, 32], sizes = [8, 8], strides = [1, 1]} : vector<16x64xf32> to vector<8x8xf32>
    %48 = vector.extract_strided_slice %5 {offsets = [8, 48], sizes = [8, 8], strides = [1, 1]} : vector<16x64xf32> to vector<8x8xf32>
    %49 = tpu.transpose %47, [1, 0] : vector<8x8xf32> -> vector<8x8xf32>
    %50 = vector.extract_strided_slice %5 {offsets = [8, 0], sizes = [8, 8], strides = [1, 1]} : vector<16x64xf32> to vector<8x8xf32>
    %51 = vector.extract_strided_slice %5 {offsets = [8, 8], sizes = [8, 8], strides = [1, 1]} : vector<16x64xf32> to vector<8x8xf32>
    %52 = tpu.concatenate %50, %51 in 0 : vector<8x8xf32>, vector<8x8xf32> -> vector<16x8xf32>
    %cst_13 = arith.constant dense<0.000000e+00> : vector<16x8xf32>
    %53 = tpu.matmul %52, %49, %cst_13 {dimension_numbers = #tpu.dot_dimension_numbers<[1], [0], [0], [1], [0, 0, 1, 1], [], []>} : vector<16x8xf32>, vector<8x8xf32>, vector<16x8xf32> -> vector<16x8xf32>
    %cst_14 = arith.constant dense<0xFF800000> : vector<16xf32>
    %54 = vector.multi_reduction <maximumf>, %53, %cst_14 [1] : vector<16x8xf32> to vector<16xf32>
    %55 = vector.shape_cast %54 : vector<16xf32> to vector<16x1xf32>
    %56 = vector.broadcast %55 : vector<16x1xf32> to vector<16x8xf32>
    %57 = arith.subf %53, %56 : vector<16x8xf32>
    %58 = math.exp %57 : vector<16x8xf32>
    %cst_15 = arith.constant dense<0.000000e+00> : vector<16xf32>
    %59 = vector.multi_reduction <add>, %58, %cst_15 [1] : vector<16x8xf32> to vector<16xf32>
    %60 = vector.shape_cast %59 : vector<16xf32> to vector<16x1xf32>
    %61 = tpu.reciprocal %60 {approx = true} : vector<16x1xf32> -> vector<16x1xf32>
    %62 = vector.broadcast %61 : vector<16x1xf32> to vector<16x8xf32>
    %63 = arith.mulf %58, %62 : vector<16x8xf32>
    %cst_16 = arith.constant dense<0.000000e+00> : vector<16x8xf32>
    %64 = tpu.matmul %63, %48, %cst_16 {dimension_numbers = #tpu.dot_dimension_numbers<[1], [0], [0], [1], [0, 0, 1, 1], [], []>} : vector<16x8xf32>, vector<8x8xf32>, vector<16x8xf32> -> vector<16x8xf32>
    %65 = vector.extract_strided_slice %64 {offsets = [0, 0], sizes = [8, 8], strides = [1, 1]} : vector<16x8xf32> to vector<8x8xf32>
    %66 = vector.extract_strided_slice %64 {offsets = [8, 0], sizes = [8, 8], strides = [1, 1]} : vector<16x8xf32> to vector<8x8xf32>
    %67 = vector.extract_strided_slice %5 {offsets = [8, 40], sizes = [8, 8], strides = [1, 1]} : vector<16x64xf32> to vector<8x8xf32>
    %68 = vector.extract_strided_slice %5 {offsets = [8, 56], sizes = [8, 8], strides = [1, 1]} : vector<16x64xf32> to vector<8x8xf32>
    %69 = tpu.transpose %67, [1, 0] : vector<8x8xf32> -> vector<8x8xf32>
    %70 = vector.extract_strided_slice %5 {offsets = [8, 16], sizes = [8, 8], strides = [1, 1]} : vector<16x64xf32> to vector<8x8xf32>
    %71 = vector.extract_strided_slice %5 {offsets = [8, 24], sizes = [8, 8], strides = [1, 1]} : vector<16x64xf32> to vector<8x8xf32>
    %72 = tpu.concatenate %70, %71 in 0 : vector<8x8xf32>, vector<8x8xf32> -> vector<16x8xf32>
    %cst_17 = arith.constant dense<0.000000e+00> : vector<16x8xf32>
    %73 = tpu.matmul %72, %69, %cst_17 {dimension_numbers = #tpu.dot_dimension_numbers<[1], [0], [0], [1], [0, 0, 1, 1], [], []>} : vector<16x8xf32>, vector<8x8xf32>, vector<16x8xf32> -> vector<16x8xf32>
    %cst_18 = arith.constant dense<0xFF800000> : vector<16xf32>
    %74 = vector.multi_reduction <maximumf>, %73, %cst_18 [1] : vector<16x8xf32> to vector<16xf32>
    %75 = vector.shape_cast %74 : vector<16xf32> to vector<16x1xf32>
    %76 = vector.broadcast %75 : vector<16x1xf32> to vector<16x8xf32>
    %77 = arith.subf %73, %76 : vector<16x8xf32>
    %78 = math.exp %77 : vector<16x8xf32>
    %cst_19 = arith.constant dense<0.000000e+00> : vector<16xf32>
    %79 = vector.multi_reduction <add>, %78, %cst_19 [1] : vector<16x8xf32> to vector<16xf32>
    %80 = vector.shape_cast %79 : vector<16xf32> to vector<16x1xf32>
    %81 = tpu.reciprocal %80 {approx = true} : vector<16x1xf32> -> vector<16x1xf32>
    %82 = vector.broadcast %81 : vector<16x1xf32> to vector<16x8xf32>
    %83 = arith.mulf %78, %82 : vector<16x8xf32>
    %cst_20 = arith.constant dense<0.000000e+00> : vector<16x8xf32>
    %84 = tpu.matmul %83, %68, %cst_20 {dimension_numbers = #tpu.dot_dimension_numbers<[1], [0], [0], [1], [0, 0, 1, 1], [], []>} : vector<16x8xf32>, vector<8x8xf32>, vector<16x8xf32> -> vector<16x8xf32>
    %85 = vector.extract_strided_slice %84 {offsets = [0, 0], sizes = [8, 8], strides = [1, 1]} : vector<16x8xf32> to vector<8x8xf32>
    %86 = vector.extract_strided_slice %84 {offsets = [8, 0], sizes = [8, 8], strides = [1, 1]} : vector<16x8xf32> to vector<8x8xf32>
    %87 = tpu.concatenate %65, %66, %85, %86 in 1 : vector<8x8xf32>, vector<8x8xf32>, vector<8x8xf32>, vector<8x8xf32> -> vector<8x32xf32>
    %88 = tpu.concatenate %46, %87 in 0 : vector<8x32xf32>, vector<8x32xf32> -> vector<16x32xf32>
    %c0_21 = arith.constant 0 : index
    %c0_22 = arith.constant 0 : index
    %89 = vector.load %arg3[%c0_21, %c0_22] : memref<32x32xf32, #tpu.memory_space<vmem>>, vector<32x32xf32>
    %cst_23 = arith.constant dense<0.000000e+00> : vector<16x32xf32>
    %90 = tpu.matmul %88, %89, %cst_23 {dimension_numbers = #tpu.dot_dimension_numbers<[1], [0], [0], [1], [0, 0, 1, 1], [], []>} : vector<16x32xf32>, vector<32x32xf32>, vector<16x32xf32> -> vector<16x32xf32>
    %c0_24 = arith.constant 0 : index
    %c0_25 = arith.constant 0 : index
    %91 = vector.load %arg4[%c0_24, %c0_25] : memref<1x32xf32, #tpu.memory_space<vmem>>, vector<1x32xf32>
    %92 = vector.broadcast %91 : vector<1x32xf32> to vector<16x32xf32>
    %93 = arith.addf %90, %92 : vector<16x32xf32>
    %c0_26 = arith.constant 0 : index
    %c0_27 = arith.constant 0 : index
    %94 = vector.load %arg5[%c0_26, %c0_27] : memref<16x32xf32, #tpu.memory_space<vmem>>, vector<16x32xf32>
    tpu.vector_store %arg5[%c0_26, %c0_27], %93 {strides = array<i32>} : memref<16x32xf32, #tpu.memory_space<vmem>>, vector<16x32xf32>,
    return
  }
}

</mosaic_0001>

<bundles_post_ra>
// kernel: tpu_custom_call.1
= control target key start
LH: loop header
LB: loop body
LE: loop exit
PB: predicated region body
PF: predicated region fallthrough
CT: control target
= control target key end

     0   :  { %10 = vsyncpa [#allocation3], 0  ;;  %s1480_s0 = inlined_call_operand.hbm [shape: f32[16,32], index: 0, kind: input, shape index: {}]   ;;  %s1481_s1 = inlined_call_operand.hbm [shape: f32[32,64], index: 1, kind: input, shape index: {}]   ;;  %s1482_s2 = inlined_call_operand.vmem [shape: f32[1,64], index: 2, kind: input, shape index: {}]   ;;  %s1483_s3 = inlined_call_operand.hbm [shape: f32[32,32], index: 3, kind: input, shape index: {}]   ;;  %s1484_s4 = inlined_call_operand.vmem [shape: f32[1,32], index: 4, kind: input, shape index: {}]   ;;  %s1485_s5 = inlined_call_operand.hbm [shape: f32[16,32], index: 5, kind: output, shape index: {}]  }
   0x1   :  { %11 = vsyncpa [#allocation6], 0 }
   0x2   :  { %12 = vsyncpa [#allocation4], 0  ;;  %s1328_s18 = smov [#allocation5]   ;;  %s1329_s20 = smov [#allocation2]  }
   0x3   :  { %s30_s19 = sshll.u32 %s1328_s18, 4  ;;  %s18_s21 = sshll.u32 %s1329_s20, 4  ;;  %s31_s19 = int_to_ptr.vmem [resolvable:$true] %s30_s19  ;;  %s19_s21 = int_to_ptr.vmem [resolvable:$true] %s18_s21 }
   0x4   :  { %s1250_s22 = scalar_lea.vmem %s31_s19, 512  ;;  %p1255_p1 = scmp.lt.s32.totalorder %s31_s19, %s31_s19 }
   0x5   :  { %p1251_p0 = scmp.ne.s32.totalorder %s31_s19, %s1250_s22  ;;  %p1256_p2 = scmp.lt.s32.totalorder %s1250_s22, %s1250_s22 }
   0x7   :  { %p1257_p3 = por %p1256_p2, %p1255_p1 }
   0x9   :  { %p1258_p4 = pnand %p1257_p3, %p1251_p0 }
   0xb   :  { %1261 = shalt.err (!%p1258_p4)
}
   0xc   :  { %s1330_s23 = smov 128   ;;  %s1331_s24 = smov 8  }
   0xd   :  { %36 = dma.hbm_to_vmem [thread:$0]  %s1481_s1, 512, %s31_s19, [#allocation6], %s1330_s23, %s1330_s23, %s1331_s24  }
   0xe   :  { %s1270_s27 = scalar_lea.vmem %s19_s21, 256  ;;  %p1275_p6 = scmp.lt.s32.totalorder %s19_s21, %s19_s21 }
   0xf   :  { %p1271_p5 = scmp.ne.s32.totalorder %s19_s21, %s1270_s27  ;;  %p1276_p7 = scmp.lt.s32.totalorder %s1270_s27, %s1270_s27 }
  0x11   :  { %p1277_p8 = por %p1276_p7, %p1275_p6 }
  0x13   :  { %p1278_p9 = pnand %p1277_p8, %p1271_p5 }
  0x15   :  { %1281 = shalt.err (!%p1278_p9)
}
  0x16   :  { %24 = dma.hbm_to_vmem [thread:$0]  %s1480_s0, 256, %s19_s21, [#allocation3], %s1330_s23, %s1330_s23, %s1331_s24  }
  0x17   :  { %s1332_s30 = smov [#allocation7]  }
  0x18   :  { %s44_s6 = sshll.u32 %s1332_s30, 4  ;;  %s45_s6 = int_to_ptr.vmem [resolvable:$true] %s44_s6 }
  0x19   :  { %s1290_s7 = scalar_lea.vmem %s45_s6, 512  ;;  %p1295_p11 = scmp.lt.s32.totalorder %s45_s6, %s45_s6 }
  0x1a   :  { %p1291_p10 = scmp.ne.s32.totalorder %s45_s6, %s1290_s7  ;;  %p1296_p12 = scmp.lt.s32.totalorder %s1290_s7, %s1290_s7 }
  0x1c   :  { %p1297_p13 = por %p1296_p12, %p1295_p11 }
  0x1e   :  { %p1298_p0 = pnand %p1297_p13, %p1291_p10 }
  0x20   :  { %1301 = shalt.err (!%p1298_p0)
}
  0x21   :  { %50 = dma.hbm_to_vmem [thread:$0]  %s1483_s3, 512, %s45_s6, [#allocation6], %s1330_s23, %s1330_s23, %s1331_s24  }
  0x22   :  { %1322 = dma.done.wait [#allocation3], 256  }
  0x23   :  { %1323 = vsyncadd [#allocation3], 4294967040 }
  0x24   :  { %1324 = dma.done.wait [#allocation6], 1024  }
  0x25   :  { %1325 = vsyncadd [#allocation6], 4294966272  ;;  %vm75_vm0 = vcmask 261120   ;;  %v67_v0 = vld [vmem:[#allocation5 + $0x18] sm:$0xff]  ;;  %v66_v1 = vld [vmem:[#allocation5 + $0x10] sm:$0xff]  ;;  %vm162_vm1 = vcmask 64512  }
  0x26   :  { %1134 = vmatprep.subr.mxu0 %v67_v0  ;;  %v62_v2 = vld [vmem:[#allocation2] sm:$0xff]  ;;  %v65_v3 = vld [vmem:[#allocation5 + $0x8] sm:$0xff]  ;;  %v64_v4 = vld [vmem:[#allocation5] sm:$0xff]  ;;  %s1333_s9 = smov 96   ;;  %s1334_s10 = smov 120   ;;  %vm556_vm2 = vcmask 130048  }
  0x27   :  { %1135 = vmatpush3.msra.mxu0 %v67_v0  ;;  %1142 = vmatprep.mubr.msk.f32.mxu0 %vm75_vm0, %v62_v2  ;;  %v63_v5 = vld [vmem:[#allocation2 + $0x8] sm:$0xff]  ;;  %v1072_v6 = vld [vmem:[%s1482_s2] ss:$0 sm:$0xff]  ;;  %s1335_s2 = smov 80   ;;  %s1336_s11 = smov 88   ;;  %vm558_vm3 = vcmask 195584  }
  0x28   :  { %1136 = vmatprep.subr.mxu0 %v66_v1  ;;  %s1337_s12 = smov 112   ;;  %s1338_s13 = smov 72  }
  0x29   :  { %1137 = vmatpush3.msra.mxu0 %v66_v1  ;;  %s1339_s14 = smov 24   ;;  %s1340_s15 = smov 16  }
  0x2a   :  { %1138 = vmatprep.subr.mxu0 %v65_v3  ;;  %s1341_s18 = smov [#allocation8]  }
  0x2b   :  { %1139 = vmatpush3.msra.mxu0 %v65_v3  ;;  %s1059_s19 = sshll.u32 %s1341_s18, 4  ;;  %s1060_s19 = int_to_ptr.vmem [resolvable:$true] %s1059_s19 }
  0x2c   :  { %1140 = vmatprep.subr.mxu0 %v64_v4  ;;  %s1302_s20 = scalar_lea.vmem %s1060_s19, 256  ;;  %p1307_p2 = scmp.lt.s32.totalorder %s1060_s19, %s1060_s19 }
  0x2d   :  { %1141 = vmatpush3.msra.mxu0 %v64_v4  ;;  %p1303_p1 = scmp.ne.s32.totalorder %s1060_s19, %s1302_s20  ;;  %p1308_p3 = scmp.lt.s32.totalorder %s1302_s20, %s1302_s20 }
  0x2e   :  { %1143 = vmatmul.mubr.msk.f32.vlgmr.msra.gmra.mxu0 %vm75_vm0, %v63_v5 }
  0x2f   :  { %p1309_p4 = por %p1308_p3, %p1307_p2 }
  0x31   :  { %p1310_p5 = pnand %p1309_p4, %p1303_p1 }
  0xee   :  { %v1144_v7 = vpop.f32.mrf.mxu0 }
  0xef   :  { %v1395_v8 = vadd.f32 %v1144_v7, %v1072_v6 }
  0xf0   :  { %v148_v9 = vpop.f32.mrf.mxu0 }
  0xf1   :  { %v1397_v10 = vadd.f32 %v1072_v6, %v148_v9  ;;  %1167 = vmatprep.mubr.msk.f32.mxu0 %vm162_vm1, %v1395_v8 }
  0xf3   :  { %160 = vrot.lane.b32.xlu0 %v1397_v10, %s1333_s9  ;;  %1147 = vmatprep.mubr.msk.f32.mxu1 %vm162_vm1, %v1397_v10 }
  0xf7   :  { %158 = vrot.lane.b32.xlu0 %v1397_v10, %s1334_s10 }
  0xfb   :  { %561 = vrot.lane.b32.xlu0 %v1395_v8, %s1334_s10 }
 0x165   :  { %v161_v11 = vpop.permute.xlu0 %160 }
 0x166   :  { %1145 = vmatprep.subr.msk.mxu1 %vm162_vm1, %v161_v11 }
 0x167   :  { %1146 = vmatpush3.xpose.msk.msra.mxu1 %vm162_vm1, %v161_v11 }
 0x169   :  { %v159_v12 = vpop.permute.xlu0 %158 }
 0x16a   :  { %1148 = vmatmul.mubr.msk.f32.vlgmr.msra.gmra.mxu1 %vm162_vm1, %v159_v12 }
 0x16d   :  { %v562_v29 = vpop.permute.xlu0 %561 }
 0x22a   :  { %v1149_v13 = vpop.f32.mrf.mxu1 }
 0x22b   :  { %v247_v16 = vsel %vm162_vm1, %v1149_v13, -inf }
 0x22c   :  { %v235_v14 = vpop.f32.mrf.mxu1 }
 0x22d   :  { %v244_v15 = vsel %vm162_vm1, %v235_v14, -inf }
 0x22e   :  { %245 = vmax.xlane.f32.xlu1 %v244_v15 }
 0x232   :  { %248 = vmax.xlane.f32.xlu1 %v247_v16 }
 0x243   :  { %266 = vrot.lane.b32.xlu1 %v1397_v10, %s1335_s2 }
 0x247   :  { %354 = vrot.lane.b32.xlu1 %v1397_v10, %s1336_s11 }
 0x24b   :  { %350 = vrot.lane.b32.xlu1 %v1397_v10, %s1337_s12 }
 0x24f   :  { %352 = vrot.lane.b32.xlu1 %v159_v12, %s1337_s12 }
 0x2b7   :  { %v246_v17 = vpop.xlane.xlu1 %245 }
 0x2b8   :  { %v250_v18 = vsub.f32 %v235_v14, %v246_v17 }
 0x2ba   :  { %v252_v19 = vmul.f32 1.442695, %v250_v18 }
 0x2bb   :  { %v249_v20 = vpop.xlane.xlu1 %248 }
 0x2bc   :  { %1210 = vpow2.f32 %v252_v19  ;;  %v251_v21 = vsub.f32 %v1149_v13, %v249_v20 }
 0x2be   :  { %v254_v22 = vmul.f32 1.442695, %v251_v21 }
 0x2bf   :  { %v267_v23 = vpop.permute.xlu1 %266 }
 0x2c0   :  { %1212 = vpow2.f32 %v254_v22  ;;  %1150 = vmatprep.subr.mxu1 %v267_v23 }
 0x2c1   :  { %1151 = vmatpush3.msra.mxu1 %v267_v23 }
 0x2c3   :  { %v355_v24 = vpop.permute.xlu1 %354 }
 0x2c4   :  { %1155 = vmatprep.subr.msk.mxu1 %vm162_vm1, %v355_v24 }
 0x2c7   :  { %v351_v30 = vpop.permute.xlu1 %350 }
 0x2c9   :  { %v1211_v25 = vpop.eup %1210 }
 0x2ca   :  { %v256_v26 = vsel %vm162_vm1, %v1211_v25, 0.0 }
 0x2cb   :  { %257 = vadd.xlane.f32.xlu1 %v256_v26  ;;  %v353_v31 = vpop.permute.xlu1 %352 }
 0x2cd   :  { %v1213_v27 = vpop.eup %1212 }
 0x2ce   :  { %v259_v28 = vsel %vm162_vm1, %v1213_v27, 0.0 }
 0x2cf   :  { %260 = vadd.xlane.f32.xlu0 %v259_v28 }
 0x2dc   :  { %563 = vrot.lane.b32.xlu1 %v1395_v8, %s1333_s9 }
 0x2e0   :  { %752 = vrot.lane.b32.xlu1 %v1395_v8, %s1337_s12 }
 0x2e4   :  { %754 = vrot.lane.b32.xlu1 %v562_v29, %s1337_s12 }
 0x2e5   :  { %756 = vrot.lane.b32.xlu0 %v1395_v8, %s1336_s11 }
 0x354   :  { %v258_v32 = vpop.xlane.xlu1 %257 }
 0x355   :  { %1214 = vrcp.f32 %v258_v32 }
 0x358   :  { %v261_v33 = vpop.xlane.xlu0 %260  ;;  %v564_v34 = vpop.permute.xlu1 %563 }
 0x359   :  { %1216 = vrcp.f32 %v261_v33  ;;  %1165 = vmatprep.subr.msk.mxu0 %vm162_vm1, %v564_v34 }
 0x35a   :  { %1166 = vmatpush3.xpose.msk.msra.mxu0 %vm162_vm1, %v564_v34 }
 0x35c   :  { %v757_v35 = vpop.permute.xlu0 %756  ;;  %v753_v36 = vpop.permute.xlu1 %752 }
 0x35d   :  { %1168 = vmatmul.mubr.msk.f32.vlgmr.msra.gmra.mxu0 %vm162_vm1, %v562_v29  ;;  %1175 = vmatprep.subr.msk.mxu0 %vm162_vm1, %v757_v35 }
 0x35e   :  { %1176 = vmatpush3.xpose.msk.msra.mxu0 %vm162_vm1, %v757_v35  ;;  %1177 = vmatprep.mubr.msk.f32.mxu0 %vm162_vm1, %v753_v36 }
 0x360   :  { %v755_v37 = vpop.permute.xlu1 %754 }
 0x361   :  { %1178 = vmatmul.mubr.msk.f32.vlgmr.msra.gmra.mxu0 %vm162_vm1, %v755_v37 }
 0x362   :  { %v1215_v38 = vpop.eup %1214 }
 0x363   :  { %v264_v39 = vmul.f32 %v1215_v38, %v1211_v25 }
 0x365   :  { %1152 = vmatprep.mubr.msk.f32.mxu1 %vm162_vm1, %v264_v39 }
 0x366   :  { %v1217_v40 = vpop.eup %1216 }
 0x367   :  { %v265_v41 = vmul.f32 %v1217_v40, %v1213_v27 }
 0x369   :  { %1153 = vmatmul.mubr.msk.f32.vlgmr.msra.gmra.mxu1 %vm162_vm1, %v265_v41 }
 0x36a   :  { %1156 = vmatpush3.xpose.msk.msra.mxu1 %vm162_vm1, %v355_v24  ;;  %1157 = vmatprep.mubr.msk.f32.mxu1 %vm162_vm1, %v351_v30 }
 0x36d   :  { %1158 = vmatmul.mubr.msk.f32.vlgmr.msra.gmra.mxu1 %vm162_vm1, %v353_v31 }
 0x41d   :  { %v1169_v42 = vpop.f32.mrf.mxu0 }
 0x41e   :  { %v649_v54 = vsel %vm162_vm1, %v1169_v42, -inf }
 0x41f   :  { %v637_v43 = vpop.f32.mrf.mxu0 }
 0x420   :  { %v646_v53 = vsel %vm162_vm1, %v637_v43, -inf }
 0x421   :  { %v1179_v45 = vpop.f32.mrf.mxu0 }
 0x422   :  { %v842_v55 = vsel %vm162_vm1, %v1179_v45, -inf }
 0x423   :  { %v830_v49 = vpop.f32.mrf.mxu0 }
 0x424   :  { %v839_v52 = vsel %vm162_vm1, %v830_v49, -inf }
 0x429   :  { %v1435_v44 = vpop.f32.mrf.mxu1 }
 0x42b   :  { %v1437_v46 = vpop.f32.mrf.mxu1 }
 0x42d   :  { %v1159_v47 = vpop.f32.mrf.mxu1 }
 0x42e   :  { %v440_v48 = vsel %vm162_vm1, %v1159_v47, -inf }
 0x42f   :  { %441 = vmax.xlane.f32.xlu0 %v440_v48  ;;  %v428_v50 = vpop.f32.mrf.mxu1 }
 0x430   :  { %v437_v51 = vsel %vm162_vm1, %v428_v50, -inf }
 0x431   :  { %438 = vmax.xlane.f32.xlu1 %v437_v51 }
 0x433   :  { %840 = vmax.xlane.f32.xlu0 %v839_v52 }
 0x435   :  { %647 = vmax.xlane.f32.xlu1 %v646_v53 }
 0x439   :  { %650 = vmax.xlane.f32.xlu1 %v649_v54 }
 0x43d   :  { %843 = vmax.xlane.f32.xlu1 %v842_v55 }
 0x4b8   :  { %v442_v56 = vpop.xlane.xlu0 %441 }
 0x4b9   :  { %v444_v3 = vsub.f32 %v1159_v47, %v442_v56  ;;  %v960_v47 = vld [vmem:[#allocation7] sm:$0xff] }
 0x4ba   :  { %v439_v57 = vpop.xlane.xlu1 %438 }
 0x4bb   :  { %v443_v62 = vsub.f32 %v428_v50, %v439_v57  ;;  %v447_v9 = vmul.f32 1.442695, %v444_v3 }
 0x4bc   :  { %v841_v58 = vpop.xlane.xlu0 %840 }
 0x4bd   :  { %v845_v59 = vsub.f32 %v830_v49, %v841_v58  ;;  %v445_v4 = vmul.f32 1.442695, %v443_v62 }
 0x4be   :  { %v648_v60 = vpop.xlane.xlu1 %647 }
 0x4bf   :  { %v652_v61 = vsub.f32 %v637_v43, %v648_v60  ;;  %v847_v63 = vmul.f32 1.442695, %v845_v59  ;;  %v963_v43 = vld [vmem:[#allocation7 + $0x18] sm:$0xff] }
 0x4c0   :  { %1185 = vmatprep.subr.mxu0 %v963_v43 }
 0x4c1   :  { %v654_v0 = vmul.f32 1.442695, %v652_v61  ;;  %1186 = vmatpush3.msra.mxu0 %v963_v43 }
 0x4c2   :  { %v651_v1 = vpop.xlane.xlu1 %650 }
 0x4c3   :  { %1218 = vpow2.f32 %v654_v0  ;;  %v653_v2 = vsub.f32 %v1169_v42, %v651_v1 }
 0x4c4   :  { %1220 = vpow2.f32 %v847_v63 }
 0x4c5   :  { %v656_v5 = vmul.f32 1.442695, %v653_v2  ;;  %v1095_v2 = vld [vmem:[%s1484_s4] ss:$0 sm:$0xff] }
 0x4c6   :  { %v844_v6 = vpop.xlane.xlu1 %843 }
 0x4c7   :  { %1222 = vpow2.f32 %v656_v5  ;;  %v846_v7 = vsub.f32 %v1179_v45, %v844_v6  ;;  %v961_v45 = vld [vmem:[#allocation7 + $0x8] sm:$0xff] }
 0x4c8   :  { %1224 = vpow2.f32 %v445_v4 }
 0x4c9   :  { %v849_v11 = vmul.f32 1.442695, %v846_v7 }
 0x4cb   :  { %1226 = vpow2.f32 %v849_v11 }
 0x4cc   :  { %1228 = vpow2.f32 %v447_v9 }
 0x4d0   :  { %v1219_v12 = vpop.eup %1218 }
 0x4d1   :  { %v658_v13 = vsel %vm162_vm1, %v1219_v12, 0.0  ;;  %v1221_v14 = vpop.eup %1220 }
 0x4d2   :  { %659 = vadd.xlane.f32.xlu0 %v658_v13  ;;  %v851_v16 = vsel %vm162_vm1, %v1221_v14, 0.0 }
 0x4d4   :  { %v1223_v15 = vpop.eup %1222 }
 0x4d5   :  { %v661_v17 = vsel %vm162_vm1, %v1223_v15, 0.0  ;;  %v1225_v18 = vpop.eup %1224 }
 0x4d6   :  { %852 = vadd.xlane.f32.xlu0 %v851_v16  ;;  %662 = vadd.xlane.f32.xlu1 %v661_v17  ;;  %v449_v20 = vsel %vm162_vm1, %v1225_v18, 0.0 }
 0x4d8   :  { %v1227_v19 = vpop.eup %1226 }
 0x4d9   :  { %v854_v21 = vsel %vm162_vm1, %v1227_v19, 0.0  ;;  %v1229_v22 = vpop.eup %1228 }
 0x4da   :  { %450 = vadd.xlane.f32.xlu0 %v449_v20  ;;  %855 = vadd.xlane.f32.xlu1 %v854_v21  ;;  %v452_v23 = vsel %vm162_vm1, %v1229_v22, 0.0 }
 0x4de   :  { %453 = vadd.xlane.f32.xlu1 %v452_v23 }
 0x4ef   :  { %668 = vrot.lane.b32.xlu1 %v1395_v8, %s1335_s2 }
 0x4f0   :  { %459 = vrot.lane.b32.xlu0 %v1397_v10, %s1338_s13 }
 0x4f3   :  { %861 = vrot.lane.b32.xlu1 %v1395_v8, %s1338_s13 }
 0x4f4   :  { %544 = vrot.lane.b32.xlu0 %v1435_v44, %s1331_s24  ;;  %v962_v44 = vld [vmem:[#allocation7 + $0x10] sm:$0xff] }
 0x4f5   :  { %1187 = vmatprep.subr.mxu0 %v962_v44 }
 0x4f6   :  { %1188 = vmatpush3.msra.mxu0 %v962_v44 }
 0x4f7   :  { %1189 = vmatprep.subr.mxu0 %v961_v45 }
 0x4f8   :  { %1190 = vmatpush3.msra.mxu0 %v961_v45 }
 0x4f9   :  { %1191 = vmatprep.subr.mxu0 %v960_v47 }
 0x4fa   :  { %1192 = vmatpush3.msra.mxu0 %v960_v47 }
 0x55b   :  { %v660_v24 = vpop.xlane.xlu0 %659 }
 0x55f   :  { %v853_v25 = vpop.xlane.xlu0 %852  ;;  %v663_v26 = vpop.xlane.xlu1 %662 }
 0x563   :  { %v451_v27 = vpop.xlane.xlu0 %450  ;;  %v856_v28 = vpop.xlane.xlu1 %855 }
 0x564   :  { %1230 = vrcp.f32 %v451_v27 }
 0x565   :  { %1232 = vrcp.f32 %v660_v24 }
 0x567   :  { %v460_v29 = vpop.permute.xlu0 %459  ;;  %v454_v30 = vpop.xlane.xlu1 %453 }
 0x568   :  { %1234 = vrcp.f32 %v454_v30  ;;  %1160 = vmatprep.subr.mxu1 %v460_v29 }
 0x569   :  { %1161 = vmatpush3.msra.mxu1 %v460_v29  ;;  %1236 = vrcp.f32 %v663_v26 }
 0x56a   :  { %1238 = vrcp.f32 %v853_v25 }
 0x56b   :  { %v669_v10 = vpop.permute.xlu1 %668  ;;  %1240 = vrcp.f32 %v856_v28  ;;  %v545_v55 = vpop.permute.xlu0 %544 }
 0x56c   :  { %1170 = vmatprep.subr.mxu1 %v669_v10  ;;  %v555_v56 = vsel %vm162_vm1, %v1437_v46, %v545_v55 }
 0x56f   :  { %v862_v38 = vpop.permute.xlu1 %861 }
 0x571   :  { %v1231_v8 = vpop.eup %1230 }
 0x572   :  { %v457_v31 = vmul.f32 %v1231_v8, %v1225_v18  ;;  %v1233_v32 = vpop.eup %1232 }
 0x573   :  { %v666_v36 = vmul.f32 %v1233_v32, %v1219_v12 }
 0x574   :  { %1162 = vmatprep.mubr.msk.f32.mxu1 %vm162_vm1, %v457_v31 }
 0x575   :  { %v1235_v33 = vpop.eup %1234 }
 0x576   :  { %v458_v34 = vmul.f32 %v1235_v33, %v1229_v22  ;;  %v1237_v35 = vpop.eup %1236 }
 0x577   :  { %v1239_v37 = vpop.eup %1238  ;;  %v667_v39 = vmul.f32 %v1237_v35, %v1223_v15 }
 0x578   :  { %1163 = vmatmul.mubr.msk.f32.vlgmr.msra.gmra.mxu1 %vm162_vm1, %v458_v34  ;;  %v1241_v40 = vpop.eup %1240  ;;  %v859_v41 = vmul.f32 %v1239_v37, %v1221_v14 }
 0x579   :  { %1171 = vmatpush3.msra.mxu1 %v669_v10  ;;  %1172 = vmatprep.mubr.msk.f32.mxu1 %vm162_vm1, %v666_v36  ;;  %v860_v42 = vmul.f32 %v1241_v40, %v1227_v19 }
 0x57a   :  { %1180 = vmatprep.subr.mxu1 %v862_v38 }
 0x57c   :  { %1173 = vmatmul.mubr.msk.f32.vlgmr.msra.gmra.mxu1 %vm162_vm1, %v667_v39 }
 0x57d   :  { %1181 = vmatpush3.msra.mxu1 %v862_v38  ;;  %1182 = vmatprep.mubr.msk.f32.mxu1 %vm162_vm1, %v859_v41 }
 0x580   :  { %1183 = vmatmul.mubr.msk.f32.vlgmr.msra.gmra.mxu1 %vm162_vm1, %v860_v42 }
 0x638   :  { %v1164_v48 = vpop.f32.mrf.mxu1 }
 0x639   :  { %552 = vrot.lane.b32.xlu1 %v1164_v48, %s1339_s14 }
 0x63a   :  { %v534_v49 = vpop.f32.mrf.mxu1 }
 0x63c   :  { %v1174_v50 = vpop.f32.mrf.mxu1 }
 0x63d   :  { %548 = vrot.lane.b32.xlu1 %v534_v49, %s1340_s15  ;;  %946 = vrot.lane.b32.xlu0 %v1174_v50, %s1331_s24 }
 0x63e   :  { %v743_v51 = vpop.f32.mrf.mxu1 }
 0x640   :  { %v1184_v52 = vpop.f32.mrf.mxu1 }
 0x641   :  { %954 = vrot.lane.b32.xlu1 %v1184_v52, %s1339_s14 }
 0x642   :  { %v936_v53 = vpop.f32.mrf.mxu1 }
 0x643   :  { %950 = vrot.lane.b32.xlu0 %v936_v53, %s1340_s15 }
 0x6ab   :  { %v553_v54 = vpop.permute.xlu1 %552 }
 0x6af   :  { %v549_v57 = vpop.permute.xlu1 %548  ;;  %v947_v59 = vpop.permute.xlu0 %946 }
 0x6b0   :  { %v557_v58 = vsel %vm556_vm2, %v555_v56, %v549_v57  ;;  %v957_v61 = vsel %vm162_vm1, %v743_v51, %v947_v59 }
 0x6b1   :  { %v559_v60 = vsel %vm558_vm3, %v557_v58, %v553_v54 }
 0x6b2   :  { %1193 = vmatprep.mubr.msk.f32.mxu0 %vm75_vm0, %v559_v60 }
 0x6b3   :  { %v955_v63 = vpop.permute.xlu1 %954 }
 0x6b5   :  { %v951_v62 = vpop.permute.xlu0 %950 }
 0x6b6   :  { %v958_v0 = vsel %vm556_vm2, %v957_v61, %v951_v62 }
 0x6b7   :  { %v959_v1 = vsel %vm558_vm3, %v958_v0, %v955_v63 }
 0x6b8   :  { %1194 = vmatmul.mubr.msk.f32.vlgmr.msra.gmra.mxu0 %vm75_vm0, %v959_v1 }
 0x778   :  { %v1195_v3 = vpop.f32.mrf.mxu0 }
 0x779   :  { %v1049_v46 = vadd.f32 %v1195_v3, %v1095_v2 }
 0x77a   :  { %v1043_v4 = vpop.f32.mrf.mxu0 }
 0x77b   :  { %1053 = vst.msk [vmem:[#allocation8 + $0x8] sm:$0xff] %vm75_vm0, %v1049_v46  ;;  %v1044_v5 = vadd.f32 %v1095_v2, %v1043_v4 }
 0x77d   :  { %1052 = vst.msk [vmem:[#allocation8] sm:$0xff] %vm75_vm0, %v1044_v5 }
 0x77e   :  { %1313 = shalt.err (!%p1310_p5)
}
 0x77f   :  { %1065 = dma.vmem_to_hbm [thread:$0]  %s1060_s19, 256, %s1485_s5, [#allocation4], %s1330_s23, %s1330_s23, %s1331_s24  }
 0x780   :  { %1326 = dma.done.wait [#allocation4], 256  }
 0x781   :  { %1327 = vsyncadd [#allocation4], 4294967040 }
 0x782   :  { %1069 = vsyncpa [#allocation3], 1 }
 0x783   :  { %1070 = vsyncpa [#allocation6], 1 }
 0x784   :  { %1071 = vsyncpa [#allocation4], 1 }

</bundles_post_ra>
